<compile_context>
chip_gen: v6e
topology: v6e:2x2x1
jax: 0.10.0
libtpu: 0.0.40
codegen_flags: <defaults>
</compile_context>

<pallas_src>
import functools

import jax
import jax.numpy as jnp
from jax import lax
from jax.experimental import pallas as pl
from jax.experimental.pallas import tpu as pltpu


def _down1d_kernel(xm_ref, xh_ref, w1_ref, b1_ref, w2_ref, b2_ref, o_ref, xw_ref,
                   *, lp, tp):
    # xm_ref: (1, Cin, 2*tp)      raw NCL window of this tile (no halo)
    # xh_ref: (1, 1, Cin, 8)      4 raw halo samples on each side (NCL orientation)
    # w*_ref: (3, Cin, Cout)      BN-scale-folded conv weights (compute dtype)
    # b*_ref: (1, Cout)           folded BN shift (f32)
    # o_ref : (1, Cout, tp)       NCL output tile
    # xw_ref: (2*tp + 8, Cin)     VMEM scratch: channels-last raw window incl. halo
    t = pl.program_id(1)

    # --- assemble the channels-last raw window once per tile (in-kernel layout flip) ---
    xht = xh_ref[0, 0].T                      # (8, Cin)
    xw_ref[0:4, :] = xht[0:4, :]              # left halo  (raw positions 2*t*tp-4 .. -1)
    xw_ref[4:2 * tp + 4, :] = xm_ref[0].T     # main tile  (2*tp raw samples)
    xw_ref[2 * tp + 4:2 * tp + 8, :] = xht[4:8, :]   # right halo

    cmid = w1_ref.shape[2]
    cout = w2_ref.shape[2]

    # --- conv1 fused with MaxPool1d(2): each tap = even/odd strided sublane reads + vmax,
    #     then one MXU dot with f32 accumulation.  y1 is computed for tp+2 pooled positions
    #     (one halo row each side) so conv2 needs no neighbour tile. ---
    acc1 = jnp.zeros((tp + 2, cmid), jnp.float32)
    for k in range(3):
        ev = xw_ref[pl.ds(2 * k, tp + 2, stride=2), :]
        od = xw_ref[pl.ds(2 * k + 1, tp + 2, stride=2), :]
        tap = jnp.maximum(ev, od)                             # pooled tap (tp+2, Cin)
        acc1 = acc1 + jnp.dot(tap, w1_ref[k],
                              preferred_element_type=jnp.float32)
    y1 = jnp.maximum(acc1 + b1_ref[0], 0.0)                   # BN shift (scale folded) + ReLU

    # Zero y1 rows whose global pooled position is outside [0, lp): this is exactly the
    # zero padding conv2 would see at the sequence boundaries.
    jrow = lax.broadcasted_iota(jnp.int32, (tp + 2, 1), 0)
    gpos = t * tp - 1 + jrow
    y1 = jnp.where((gpos >= 0) & (gpos < lp), y1, 0.0)
    y1c = y1.astype(xw_ref.dtype)                             # back to compute dtype for MXU

    # --- conv2 -> BN shift -> ReLU ---
    acc2 = jnp.zeros((tp, cout), jnp.float32)
    for k in range(3):
        acc2 = acc2 + jnp.dot(y1c[k:k + tp, :], w2_ref[k],
                              preferred_element_type=jnp.float32)
    y2 = jnp.maximum(acc2 + b2_ref[0], 0.0)

    # Store back in NCL orientation (length axis lane-dense).
    o_ref[0] = y2.T.astype(o_ref.dtype)


def down1d(x_ncl, w1, g1, be1, m1, v1, w2, g2, be2, m2, v2,
           *, eps=1e-5, compute_dtype=jnp.bfloat16, out_dtype=jnp.float32,
           tp_target=512):
    """x_ncl: (N, Cin, L) like PyTorch.  Returns (N, Cout, L // 2).  BN in eval mode."""
    n, cin, L = x_ncl.shape
    cmid = w1.shape[0]
    cout = w2.shape[0]
    lp = L // 2
    assert lp >= 1, "need at least 2 samples along L"

    # Pooled-length tile: whole sequence if small, else a 128-aligned tile (default 512).
    if lp <= tp_target:
        tp, num_t = lp, 1
    else:
        assert tp_target % 128 == 0, "multi-tile path needs a 128-aligned pooled tile"
        tp = tp_target
        num_t = -(-lp // tp)
    lp_pad = num_t * tp

    # Fold BatchNorm (eval mode) into the conv weights + a per-channel f32 shift.
    s1 = (g1 / jnp.sqrt(v1 + eps)).astype(jnp.float32)
    s2 = (g2 / jnp.sqrt(v2 + eps)).astype(jnp.float32)
    b1f = (be1 - m1 * s1).reshape(1, cmid).astype(jnp.float32)
    b2f = (be2 - m2 * s2).reshape(1, cout).astype(jnp.float32)
    # PyTorch (Cout, Cin, K) -> (K, Cin, Cout), scale folded in, compute dtype for the MXU.
    w1t = jnp.transpose(w1 * s1[:, None, None], (2, 1, 0)).astype(compute_dtype)
    w2t = jnp.transpose(w2 * s2[:, None, None], (2, 1, 0)).astype(compute_dtype)

    # Keep NCL layout; drop an odd trailing sample (MaxPool1d floors) and zero-pad on the
    # right so every tile window exists.  The zero padding also provides conv1's zero
    # padding at the right edge; the left edge is provided by the explicit zero halo.
    x2 = x_ncl[:, :, :2 * lp].astype(compute_dtype)
    x_main = jnp.pad(x2, ((0, 0), (0, 0), (0, 2 * lp_pad - 2 * lp)))

    # Tiny per-tile halo array (N, T, Cin, 8): 4 raw samples on each side of every tile.
    xb = x_main.reshape(n, cin, num_t, 2 * tp)
    z4 = jnp.zeros((n, cin, 1, 4), compute_dtype)
    left = jnp.concatenate([z4, xb[:, :, :num_t - 1, -4:]], axis=2)
    right = jnp.concatenate([xb[:, :, 1:, :4], z4], axis=2)
    halo = jnp.transpose(jnp.concatenate([left, right], axis=3), (0, 2, 1, 3))

    kernel = functools.partial(_down1d_kernel, lp=lp, tp=tp)

    out = pl.pallas_call(
        kernel,
        out_shape=jax.ShapeDtypeStruct((n, cout, lp_pad), out_dtype),
        grid=(n, num_t),
        in_specs=[
            pl.BlockSpec((1, cin, 2 * tp), lambda b, t: (b, 0, t)),
            pl.BlockSpec((1, 1, cin, 8), lambda b, t: (b, t, 0, 0)),
            pl.BlockSpec((3, cin, cmid), lambda b, t: (0, 0, 0)),
            pl.BlockSpec((1, cmid), lambda b, t: (0, 0)),
            pl.BlockSpec((3, cmid, cout), lambda b, t: (0, 0, 0)),
            pl.BlockSpec((1, cout), lambda b, t: (0, 0)),
        ],
        out_specs=pl.BlockSpec((1, cout, tp), lambda b, t: (b, 0, t)),
        scratch_shapes=[pltpu.VMEM((2 * tp + 8, cin), compute_dtype)],
        compiler_params=pltpu.CompilerParams(
            dimension_semantics=("parallel", "parallel")),
    )(x_main, halo, w1t, b1f, w2t, b2f)

    return out[:, :, :lp]


def _ref_forward(x, w1, g1, be1, m1, v1, w2, g2, be2, m2, v2, eps=1e-5):
    """Plain-JAX reference mirroring the PyTorch module (BN in eval mode)."""
    n, c, L = x.shape
    lp = L // 2
    xp = jnp.max(x[:, :, :2 * lp].reshape(n, c, lp, 2), axis=-1)

    def cbr(inp, w, g, be, m, v):
        y = lax.conv_general_dilated(
            inp, w, window_strides=(1,), padding=((1, 1),),
            dimension_numbers=('NCH', 'OIH', 'NCH'))
        s = g / jnp.sqrt(v + eps)
        b = be - m * s
        return jnp.maximum(y * s[None, :, None] + b[None, :, None], 0.0)

    return cbr(cbr(xp, w1, g1, be1, m1, v1), w2, g2, be2, m2, v2)


if __name__ == "__main__":
    key = jax.random.PRNGKey(0)
    N, Cin, Cout, L = 2, 4, 8, 16
    Cmid, K = Cout, 3

    ks = jax.random.split(key, 12)
    x = jax.random.normal(ks[0], (N, Cin, L), jnp.float32)

    w1 = jax.random.normal(ks[1], (Cmid, Cin, K), jnp.float32) * 0.3
    g1 = jax.random.uniform(ks[2], (Cmid,), jnp.float32, 0.5, 1.5)
    be1 = jax.random.normal(ks[3], (Cmid,), jnp.float32) * 0.1
    m1 = jax.random.normal(ks[4], (Cmid,), jnp.float32) * 0.1
    v1 = jax.random.uniform(ks[5], (Cmid,), jnp.float32, 0.5, 1.5)

    w2 = jax.random.normal(ks[6], (Cout, Cmid, K), jnp.float32) * 0.3
    g2 = jax.random.uniform(ks[7], (Cout,), jnp.float32, 0.5, 1.5)
    be2 = jax.random.normal(ks[8], (Cout,), jnp.float32) * 0.1
    m2 = jax.random.normal(ks[9], (Cout,), jnp.float32) * 0.1
    v2 = jax.random.uniform(ks[10], (Cout,), jnp.float32, 0.5, 1.5)

    params = (w1, g1, be1, m1, v1, w2, g2, be2, m2, v2)

    # 1) exact-semantics check: f32 data path, single length tile.
    out_f32 = jax.block_until_ready(down1d(x, *params, compute_dtype=jnp.float32))
    ref = _ref_forward(x, *params)
    assert out_f32.shape == (N, Cout, L // 2), out_f32.shape
    assert jnp.allclose(out_f32, ref, atol=1e-3, rtol=1e-3), \
        float(jnp.max(jnp.abs(out_f32 - ref)))

    # 2) performance configuration: bf16 inputs/weights, f32 accumulation.
    out_bf16 = jax.block_until_ready(down1d(x, *params))
    assert out_bf16.shape == (N, Cout, L // 2), out_bf16.shape
    assert jnp.allclose(out_bf16, ref, atol=5e-2, rtol=5e-2), \
        float(jnp.max(jnp.abs(out_bf16 - ref)))

    # 3) multi-tile path (grid over length tiles + halo/mask handling), f32 for a tight check.
    L3 = 640
    x3 = jax.random.normal(ks[11], (N, Cin, L3), jnp.float32)
    out3 = jax.block_until_ready(
        down1d(x3, *params, compute_dtype=jnp.float32, tp_target=128))
    ref3 = _ref_forward(x3, *params)
    assert out3.shape == (N, Cout, L3 // 2), out3.shape
    assert jnp.allclose(out3, ref3, atol=1e-3, rtol=1e-3), \
        float(jnp.max(jnp.abs(out3 - ref3)))

    print("KERNEL_OK")
</pallas_src>

<mosaic_0001>
module attributes {stable_mosaic.version = 11 : i64} {
  func.func @_down1d_kernel(%arg0: i32, %arg1: i32, %arg2: memref<1x4x16xf32, #tpu.memory_space<vmem>>, %arg3: memref<1x1x4x8xf32, #tpu.memory_space<vmem>>, %arg4: memref<3x4x8xf32, #tpu.memory_space<vmem>>, %arg5: memref<1x8xf32, #tpu.memory_space<vmem>>, %arg6: memref<3x8x8xf32, #tpu.memory_space<vmem>>, %arg7: memref<1x8xf32, #tpu.memory_space<vmem>>, %arg8: memref<1x8x8xf32, #tpu.memory_space<vmem>>, %arg9: memref<24x4xf32, #tpu.memory_space<vmem>>) attributes {dimension_semantics = [#tpu.dimension_semantics<parallel>, #tpu.dimension_semantics<parallel>], iteration_bounds = array<i64: 2, 1>, scalar_prefetch = 0 : i64, scratch_operands = 1 : i64, tpu.core_type = #tpu.core_type<tc>, window_params = [{transform_indices = @transform_0, window_bounds = array<i64: 1, 4, 16>}, {transform_indices = @transform_1, window_bounds = array<i64: 1, 1, 4, 8>}, {pipeline_mode = #tpu.pipeline_mode<synchronous>, transform_indices = @transform_2, window_bounds = array<i64: 3, 4, 8>}, {pipeline_mode = #tpu.pipeline_mode<synchronous>, transform_indices = @transform_3, window_bounds = array<i64: 1, 8>}, {pipeline_mode = #tpu.pipeline_mode<synchronous>, transform_indices = @transform_4, window_bounds = array<i64: 3, 8, 8>}, {pipeline_mode = #tpu.pipeline_mode<synchronous>, transform_indices = @transform_5, window_bounds = array<i64: 1, 8>}, {transform_indices = @transform_6, window_bounds = array<i64: 1, 8, 8>}]} {
    %c0 = arith.constant 0 : index
    %c0_0 = arith.constant 0 : index
    %c0_1 = arith.constant 0 : index
    %c0_2 = arith.constant 0 : index
    %0 = vector.load %arg3[%c0, %c0_0, %c0_1, %c0_2] : memref<1x1x4x8xf32, #tpu.memory_space<vmem>>, vector<1x1x4x8xf32>
    %1 = vector.shape_cast %0 : vector<1x1x4x8xf32> to vector<4x8xf32>
    %2 = tpu.transpose %1, [1, 0] : vector<4x8xf32> -> vector<8x4xf32>
    %3 = vector.extract_strided_slice %2 {offsets = [0, 0], sizes = [4, 4], strides = [1, 1]} : vector<8x4xf32> to vector<4x4xf32>
    %c0_3 = arith.constant 0 : index
    %c0_4 = arith.constant 0 : index
    %4 = vector.load %arg9[%c0_3, %c0_4] : memref<24x4xf32, #tpu.memory_space<vmem>>, vector<4x4xf32>
    tpu.vector_store %arg9[%c0_3, %c0_4], %3 {strides = array<i32>} : memref<24x4xf32, #tpu.memory_space<vmem>>, vector<4x4xf32>,
    %c0_5 = arith.constant 0 : index
    %c0_6 = arith.constant 0 : index
    %c0_7 = arith.constant 0 : index
    %5 = vector.load %arg2[%c0_5, %c0_6, %c0_7] : memref<1x4x16xf32, #tpu.memory_space<vmem>>, vector<1x4x16xf32>
    %6 = vector.shape_cast %5 : vector<1x4x16xf32> to vector<4x16xf32>
    %7 = tpu.transpose %6, [1, 0] : vector<4x16xf32> -> vector<16x4xf32>
    %c4 = arith.constant 4 : index
    %c0_8 = arith.constant 0 : index
    %8 = vector.load %arg9[%c4, %c0_8] : memref<24x4xf32, #tpu.memory_space<vmem>>, vector<16x4xf32>
    tpu.vector_store %arg9[%c4, %c0_8], %7 {strides = array<i32>} : memref<24x4xf32, #tpu.memory_space<vmem>>, vector<16x4xf32>,
    %9 = vector.extract_strided_slice %2 {offsets = [4, 0], sizes = [4, 4], strides = [1, 1]} : vector<8x4xf32> to vector<4x4xf32>
    %c20 = arith.constant 20 : index
    %c0_9 = arith.constant 0 : index
    %10 = vector.load %arg9[%c20, %c0_9] : memref<24x4xf32, #tpu.memory_space<vmem>>, vector<4x4xf32>
    tpu.vector_store %arg9[%c20, %c0_9], %9 {strides = array<i32>} : memref<24x4xf32, #tpu.memory_space<vmem>>, vector<4x4xf32>,
    %cst = arith.constant 0.000000e+00 : f32
    %11 = vector.broadcast %cst : f32 to vector<10x8xf32>
    %c0_10 = arith.constant 0 : index
    %c0_11 = arith.constant 0 : index
    %12 = tpu.strided_load %arg9[%c0_10, %c0_11] {strides = array<i32: 2, 1>} : memref<24x4xf32, #tpu.memory_space<vmem>>, vector<10x4xf32>
    %c1 = arith.constant 1 : index
    %c0_12 = arith.constant 0 : index
    %13 = tpu.strided_load %arg9[%c1, %c0_12] {strides = array<i32: 2, 1>} : memref<24x4xf32, #tpu.memory_space<vmem>>, vector<10x4xf32>
    %14 = arith.maximumf %12, %13 : vector<10x4xf32>
    %c0_13 = arith.constant 0 : index
    %c0_14 = arith.constant 0 : index
    %c0_15 = arith.constant 0 : index
    %15 = vector.load %arg4[%c0_13, %c0_14, %c0_15] : memref<3x4x8xf32, #tpu.memory_space<vmem>>, vector<1x4x8xf32>
    %16 = vector.shape_cast %15 : vector<1x4x8xf32> to vector<4x8xf32>
    %cst_16 = arith.constant dense<0.000000e+00> : vector<10x8xf32>
    %17 = tpu.matmul %14, %16, %cst_16 {dimension_numbers = #tpu.dot_dimension_numbers<[1], [0], [0], [1], [0, 0, 1, 1], [], []>} : vector<10x4xf32>, vector<4x8xf32>, vector<10x8xf32> -> vector<10x8xf32>
    %18 = arith.addf %11, %17 : vector<10x8xf32>
    %c2 = arith.constant 2 : index
    %c0_17 = arith.constant 0 : index
    %19 = tpu.strided_load %arg9[%c2, %c0_17] {strides = array<i32: 2, 1>} : memref<24x4xf32, #tpu.memory_space<vmem>>, vector<10x4xf32>
    %c3 = arith.constant 3 : index
    %c0_18 = arith.constant 0 : index
    %20 = tpu.strided_load %arg9[%c3, %c0_18] {strides = array<i32: 2, 1>} : memref<24x4xf32, #tpu.memory_space<vmem>>, vector<10x4xf32>
    %21 = arith.maximumf %19, %20 : vector<10x4xf32>
    %c1_19 = arith.constant 1 : index
    %c0_20 = arith.constant 0 : index
    %c0_21 = arith.constant 0 : index
    %22 = vector.load %arg4[%c1_19, %c0_20, %c0_21] : memref<3x4x8xf32, #tpu.memory_space<vmem>>, vector<1x4x8xf32>
    %23 = vector.shape_cast %22 : vector<1x4x8xf32> to vector<4x8xf32>
    %cst_22 = arith.constant dense<0.000000e+00> : vector<10x8xf32>
    %24 = tpu.matmul %21, %23, %cst_22 {dimension_numbers = #tpu.dot_dimension_numbers<[1], [0], [0], [1], [0, 0, 1, 1], [], []>} : vector<10x4xf32>, vector<4x8xf32>, vector<10x8xf32> -> vector<10x8xf32>
    %25 = arith.addf %18, %24 : vector<10x8xf32>
    %c4_23 = arith.constant 4 : index
    %c0_24 = arith.constant 0 : index
    %26 = tpu.strided_load %arg9[%c4_23, %c0_24] {strides = array<i32: 2, 1>} : memref<24x4xf32, #tpu.memory_space<vmem>>, vector<10x4xf32>
    %c5 = arith.constant 5 : index
    %c0_25 = arith.constant 0 : index
    %27 = tpu.strided_load %arg9[%c5, %c0_25] {strides = array<i32: 2, 1>} : memref<24x4xf32, #tpu.memory_space<vmem>>, vector<10x4xf32>
    %28 = arith.maximumf %26, %27 : vector<10x4xf32>
    %c2_26 = arith.constant 2 : index
    %c0_27 = arith.constant 0 : index
    %c0_28 = arith.constant 0 : index
    %29 = vector.load %arg4[%c2_26, %c0_27, %c0_28] : memref<3x4x8xf32, #tpu.memory_space<vmem>>, vector<1x4x8xf32>
    %30 = vector.shape_cast %29 : vector<1x4x8xf32> to vector<4x8xf32>
    %cst_29 = arith.constant dense<0.000000e+00> : vector<10x8xf32>
    %31 = tpu.matmul %28, %30, %cst_29 {dimension_numbers = #tpu.dot_dimension_numbers<[1], [0], [0], [1], [0, 0, 1, 1], [], []>} : vector<10x4xf32>, vector<4x8xf32>, vector<10x8xf32> -> vector<10x8xf32>
    %32 = arith.addf %25, %31 : vector<10x8xf32>
    %c0_30 = arith.constant 0 : index
    %c0_31 = arith.constant 0 : index
    %33 = vector.load %arg5[%c0_30, %c0_31] : memref<1x8xf32, #tpu.memory_space<vmem>>, vector<1x8xf32>
    %34 = vector.shape_cast %33 : vector<1x8xf32> to vector<8xf32>
    %35 = vector.shape_cast %34 : vector<8xf32> to vector<1x8xf32>
    %36 = vector.broadcast %35 : vector<1x8xf32> to vector<10x8xf32>
    %37 = arith.addf %32, %36 : vector<10x8xf32>
    %cst_32 = arith.constant 0.000000e+00 : f32
    %38 = vector.broadcast %cst_32 : f32 to vector<10x8xf32>
    %39 = arith.maximumf %37, %38 : vector<10x8xf32>
    %40 = tpu.iota {dimensions = array<i32: 0>} : vector<10x1xi32>
    %c8_i32 = arith.constant 8 : i32
    %41 = arith.muli %arg1, %c8_i32 : i32
    %c1_i32 = arith.constant 1 : i32
    %42 = arith.subi %41, %c1_i32 : i32
    %43 = vector.broadcast %42 : i32 to vector<10x1xi32>
    %44 = arith.addi %43, %40 : vector<10x1xi32>
    %c0_i32 = arith.constant 0 : i32
    %45 = vector.broadcast %c0_i32 : i32 to vector<10x1xi32>
    %46 = arith.cmpi sge, %44, %45 : vector<10x1xi32>
    %c8_i32_33 = arith.constant 8 : i32
    %47 = vector.broadcast %c8_i32_33 : i32 to vector<10x1xi32>
    %48 = arith.cmpi slt, %44, %47 : vector<10x1xi32>
    %49 = arith.andi %46, %48 : vector<10x1xi1>
    %cst_34 = arith.constant 0.000000e+00 : f32
    %50 = vector.shape_cast %49 : vector<10x1xi1> to vector<10x1xi1>
    %51 = vector.broadcast %50 : vector<10x1xi1> to vector<10x8xi1>
    %52 = vector.broadcast %cst_34 : f32 to vector<10x8xf32>
    %53 = arith.select %51, %39, %52 : vector<10x8xi1>, vector<10x8xf32>
    %cst_35 = arith.constant 0.000000e+00 : f32
    %54 = vector.broadcast %cst_35 : f32 to vector<8x8xf32>
    %55 = vector.extract_strided_slice %53 {offsets = [0, 0], sizes = [8, 8], strides = [1, 1]} : vector<10x8xf32> to vector<8x8xf32>
    %c0_36 = arith.constant 0 : index
    %c0_37 = arith.constant 0 : index
    %c0_38 = arith.constant 0 : index
    %56 = vector.load %arg6[%c0_36, %c0_37, %c0_38] : memref<3x8x8xf32, #tpu.memory_space<vmem>>, vector<1x8x8xf32>
    %57 = vector.shape_cast %56 : vector<1x8x8xf32> to vector<8x8xf32>
    %cst_39 = arith.constant dense<0.000000e+00> : vector<8x8xf32>
    %58 = tpu.matmul %55, %57, %cst_39 {dimension_numbers = #tpu.dot_dimension_numbers<[1], [0], [0], [1], [0, 0, 1, 1], [], []>} : vector<8x8xf32>, vector<8x8xf32>, vector<8x8xf32> -> vector<8x8xf32>
    %59 = arith.addf %54, %58 : vector<8x8xf32>
    %60 = vector.extract_strided_slice %53 {offsets = [1, 0], sizes = [8, 8], strides = [1, 1]} : vector<10x8xf32> to vector<8x8xf32>
    %c1_40 = arith.constant 1 : index
    %c0_41 = arith.constant 0 : index
    %c0_42 = arith.constant 0 : index
    %61 = vector.load %arg6[%c1_40, %c0_41, %c0_42] : memref<3x8x8xf32, #tpu.memory_space<vmem>>, vector<1x8x8xf32>
    %62 = vector.shape_cast %61 : vector<1x8x8xf32> to vector<8x8xf32>
    %cst_43 = arith.constant dense<0.000000e+00> : vector<8x8xf32>
    %63 = tpu.matmul %60, %62, %cst_43 {dimension_numbers = #tpu.dot_dimension_numbers<[1], [0], [0], [1], [0, 0, 1, 1], [], []>} : vector<8x8xf32>, vector<8x8xf32>, vector<8x8xf32> -> vector<8x8xf32>
    %64 = arith.addf %59, %63 : vector<8x8xf32>
    %65 = vector.extract_strided_slice %53 {offsets = [2, 0], sizes = [8, 8], strides = [1, 1]} : vector<10x8xf32> to vector<8x8xf32>
    %c2_44 = arith.constant 2 : index
    %c0_45 = arith.constant 0 : index
    %c0_46 = arith.constant 0 : index
    %66 = vector.load %arg6[%c2_44, %c0_45, %c0_46] : memref<3x8x8xf32, #tpu.memory_space<vmem>>, vector<1x8x8xf32>
    %67 = vector.shape_cast %66 : vector<1x8x8xf32> to vector<8x8xf32>
    %cst_47 = arith.constant dense<0.000000e+00> : vector<8x8xf32>
    %68 = tpu.matmul %65, %67, %cst_47 {dimension_numbers = #tpu.dot_dimension_numbers<[1], [0], [0], [1], [0, 0, 1, 1], [], []>} : vector<8x8xf32>, vector<8x8xf32>, vector<8x8xf32> -> vector<8x8xf32>
    %69 = arith.addf %64, %68 : vector<8x8xf32>
    %c0_48 = arith.constant 0 : index
    %c0_49 = arith.constant 0 : index
    %70 = vector.load %arg7[%c0_48, %c0_49] : memref<1x8xf32, #tpu.memory_space<vmem>>, vector<1x8xf32>
    %71 = vector.shape_cast %70 : vector<1x8xf32> to vector<8xf32>
    %72 = vector.shape_cast %71 : vector<8xf32> to vector<1x8xf32>
    %73 = vector.broadcast %72 : vector<1x8xf32> to vector<8x8xf32>
    %74 = arith.addf %69, %73 : vector<8x8xf32>
    %cst_50 = arith.constant 0.000000e+00 : f32
    %75 = vector.broadcast %cst_50 : f32 to vector<8x8xf32>
    %76 = arith.maximumf %74, %75 : vector<8x8xf32>
    %77 = tpu.transpose %76, [1, 0] : vector<8x8xf32> -> vector<8x8xf32>
    %c0_51 = arith.constant 0 : index
    %c0_52 = arith.constant 0 : index
    %c0_53 = arith.constant 0 : index
    %78 = vector.load %arg8[%c0_51, %c0_52, %c0_53] : memref<1x8x8xf32, #tpu.memory_space<vmem>>, vector<1x8x8xf32>
    %79 = vector.shape_cast %78 : vector<1x8x8xf32> to vector<8x8xf32>
    %80 = vector.shape_cast %77 : vector<8x8xf32> to vector<1x8x8xf32>
    tpu.vector_store %arg8[%c0_51, %c0_52, %c0_53], %80 {strides = array<i32>} : memref<1x8x8xf32, #tpu.memory_space<vmem>>, vector<1x8x8xf32>,
    return
  }
  func.func @transform_0(%arg0: i32, %arg1: i32) -> (i32, i32, i32) {
    %c0_i32 = arith.constant 0 : i32
    %c0_i32_0 = arith.constant 0 : i32
    return %arg0, %c0_i32, %arg1 : i32, i32, i32
  }
  func.func @transform_1(%arg0: i32, %arg1: i32) -> (i32, i32, i32, i32) {
    %c0_i32 = arith.constant 0 : i32
    %c0_i32_0 = arith.constant 0 : i32
    %c0_i32_1 = arith.constant 0 : i32
    return %arg0, %arg1, %c0_i32, %c0_i32_0 : i32, i32, i32, i32
  }
  func.func @transform_2(%arg0: i32, %arg1: i32) -> (i32, i32, i32) {
    %c0_i32 = arith.constant 0 : i32
    %c0_i32_0 = arith.constant 0 : i32
    %c0_i32_1 = arith.constant 0 : i32
    %c0_i32_2 = arith.constant 0 : i32
    return %c0_i32, %c0_i32_0, %c0_i32_1 : i32, i32, i32
  }
  func.func @transform_3(%arg0: i32, %arg1: i32) -> (i32, i32) {
    %c0_i32 = arith.constant 0 : i32
    %c0_i32_0 = arith.constant 0 : i32
    %c0_i32_1 = arith.constant 0 : i32
    return %c0_i32, %c0_i32_0 : i32, i32
  }
  func.func @transform_4(%arg0: i32, %arg1: i32) -> (i32, i32, i32) {
    %c0_i32 = arith.constant 0 : i32
    %c0_i32_0 = arith.constant 0 : i32
    %c0_i32_1 = arith.constant 0 : i32
    %c0_i32_2 = arith.constant 0 : i32
    return %c0_i32, %c0_i32_0, %c0_i32_1 : i32, i32, i32
  }
  func.func @transform_5(%arg0: i32, %arg1: i32) -> (i32, i32) {
    %c0_i32 = arith.constant 0 : i32
    %c0_i32_0 = arith.constant 0 : i32
    %c0_i32_1 = arith.constant 0 : i32
    return %c0_i32, %c0_i32_0 : i32, i32
  }
  func.func @transform_6(%arg0: i32, %arg1: i32) -> (i32, i32, i32) {
    %c0_i32 = arith.constant 0 : i32
    %c0_i32_0 = arith.constant 0 : i32
    return %arg0, %c0_i32, %arg1 : i32, i32, i32
  }
}

</mosaic_0001>

<bundles_post_ra>
// kernel: tpu_custom_call.1
= control target key start
LH: loop header
LB: loop body
LE: loop exit
PB: predicated region body
PF: predicated region fallthrough
CT: control target
= control target key end

     0   :  { %s1808_s0 = inlined_call_operand.hbm [shape: f32[2,4,16], index: 0, kind: input, shape index: {}]   ;;  %s1809_s1 = inlined_call_operand.hbm [shape: f32[2,1,4,8], index: 1, kind: input, shape index: {}]   ;;  %s1810_s2 = inlined_call_operand.hbm [shape: f32[3,4,8], index: 2, kind: input, shape index: {}]   ;;  %s1811_s3 = inlined_call_operand.vmem [shape: f32[1,8], index: 3, kind: input, shape index: {}]   ;;  %s1812_s4 = inlined_call_operand.hbm [shape: f32[3,8,8], index: 4, kind: input, shape index: {}]   ;;  %s1813_s5 = inlined_call_operand.vmem [shape: f32[1,8], index: 5, kind: input, shape index: {}]   ;;  %s1814_s6 = inlined_call_operand.hbm [shape: f32[2,8,8], index: 6, kind: output, shape index: {}]  }
   0x1   :  { %1816 = sst [smem:[#allocation17_spill]] %s1808_s0 }
   0x2   :  { %1817 = sst [smem:[#allocation18_spill]] %s1809_s1 }
   0x3   :  { %1818 = sst [smem:[#allocation19_spill]] %s1810_s2 }
   0x4   :  { %1819 = sst [smem:[#allocation20_spill]] %s1812_s4 }
   0x5   :  { %11 = vsyncpa [#allocation4], 0 }
   0x6   :  { %13 = vsyncpa [#allocation4 + $0x1], 0 }
   0x7   :  { %14 = vsyncpa [#allocation7], 0 }
   0x8   :  { %16 = vsyncpa [#allocation7 + $0x1], 0 }
   0x9   :  { %17 = vsyncpa [#allocation10], 0 }
   0xa   :  { %18 = vsyncpa [#allocation5], 0 }
   0xb   :  { %20 = vsyncpa [#allocation5 + $0x1], 0  ;;  %s1580_s21 = smov 0   ;;  %s1582_s22 = smov 0  }
   0xc   :  { %s1584_s23 = smov 0   ;;  %s1586_s24 = smov 0  }
   0xd   :  { %s1588_s25 = smov 0   ;;  %s1590_s26 = smov 0  }
   0xe LB: > { %s1611_s27 = sadd.s32 4294967295, %s1532_s26   ;;  %s1160_s28 = sadd.s32 4294967294, %s1532_s26   ;;  %s1532_s26 = sphi %s1590_s26, %s26_s26   ;;  %s1528_s25 = sphi %s1588_s25, %s1841_s25   ;;  %s1524_s24 = sphi %s1586_s24, %s1840_s24   ;;  %s1520_s23 = sphi %s1584_s23, %s1839_s23   ;;  %s1516_s22 = sphi %s1582_s22, %s1838_s22   ;;  %s1512_s21 = sphi %s1580_s21, %s1837_s21  }
   0xf   : > { %p60_p0 = scmp.ne.s32.totalorder %s1516_s22, %s1512_s21  ;;  %p1815_p1 = scmp.eq.s32.totalorder %s1611_s27, 0 }
  0x10   : > { %p204_p3 = scmp.eq.s32.totalorder %s1160_s28, 1  ;;  %p1161_p5 = scmp.ge.s32.totalorder %s1532_s26, 1 }
  0x11   : > { %p1620_p4 = por %p1815_p1, %p60_p0  ;;  %p211_p7 = scmp.lt.s32.totalorder %s1532_s26, 3 }
  0x12   : > { %p1625_p6 = por %p204_p3, %p60_p0  ;;  %s1534_s8 = smov [#allocation8]  }
  0x13   : > { %p1630_p8 = pnand %p1161_p5, %p211_p7  ;;  %s223_s9 = sshll.u32 %s1534_s8, 4  ;;  %s224_s9 = int_to_ptr.vmem [resolvable:$true] %s223_s9 }
  0x14   : > { %s1821_s30 = scalar_select %p1625_p6, 1, 0 }
  0x15   : > { %p1252_p9 = pneg %p1630_p8  ;;  %s1535_s11 = smov [#allocation9]  }
  0x16   : > { %s239_s12 = sshll.u32 %s1535_s11, 4  ;;  %s1343_s13 = scalar_lea.vmem %s224_s9, 192  ;;  %s240_s12 = int_to_ptr.vmem [resolvable:$true] %s239_s12 }
  0x17   : > { %p1639_p11 = pnand %p1252_p9, %p1815_p1  ;;  %p1344_p13 = scmp.ne.s32.totalorder %s224_s9, %s1343_s13 }
  0x18   : > { %p1351_p5 = scmp.lt.s32.totalorder %s224_s9, %s224_s9  ;;  %p1352_p7 = scmp.lt.s32.totalorder %s1343_s13, %s1343_s13 }
  0x19   : > { %p1334_p12 = pneg %p1639_p11 }
  0x1a   : > { %p1353_p10 = por %p1352_p7, %p1351_p5 }
  0x1b   : > { %p1346_p0 = pnand %p1344_p13, %p1334_p12 }
  0x1d   : > { %p1347_p3 = pneg %p1346_p0 }
  0x1f   : > { %p1354_p9 = pnand %p1353_p10, %p1347_p3 }
  0x21   : > { %1357 = shalt.err (!%p1354_p9)
}
  0x22   : > { %s1536_s14 = smov 64   ;;  %s1537_s15 = smov 4  }
  0x23   : > { %s1824_s2 = sld [smem:[#allocation19_spill]]  ;;  %s1369_s18 = scalar_lea.vmem %s240_s12, 384 }
  0x24   : > { %p1370_p1 = scmp.ne.s32.totalorder %s240_s12, %s1369_s18  ;;  %p1377_p2 = scmp.lt.s32.totalorder %s240_s12, %s240_s12 }
  0x25   : > { %p1378_p6 = scmp.lt.s32.totalorder %s1369_s18, %s1369_s18 }
  0x26   : > { %p1372_p13 = pnand %p1370_p1, %p1334_p12 }
  0x27   : > { %p1379_p5 = por %p1378_p6, %p1377_p2 }
  0x28   : > { %p1373_p0 = pneg %p1372_p13 }
  0x29   : > { %1255 = dma.hbm_to_vmem [thread:$0]  (!%p1639_p11), %s1824_s2, 192, %s224_s9, [#allocation7], %s1536_s14, %s1536_s14, %s1537_s15  }
  0x2a   : > { %p1380_p10 = pnand %p1379_p5, %p1373_p0 }
  0x2c   : > { %1383 = shalt.err (!%p1380_p10)
}
  0x2d   : > { %s1538_s19 = smov 128   ;;  %s1539_s20 = smov 8  }
  0x2e   : > { %s1825_s4 = sld [smem:[#allocation20_spill]]  ;;  %s38_s9 = sadd.s32 1, %s1528_s25 }
  0x2f   : > { %s47_s11 = sadd.s32 1, %s1520_s23  ;;  %p40_p1 = scmp.ge.s32.totalorder %s38_s9, 2 }
  0x30   : > { %p54_p2 = scmp.ne.s32.totalorder %s1520_s23, %s1516_s22  ;;  %p55_p6 = scmp.eq.s32.totalorder %s1532_s26, 0 }
  0x31   : > { %p1272_p12 = scmp.lt.s32.totalorder %s1532_s26, 2  ;;  %s1843_s9 = smov (%p40_p1, %s38_s9), 0 }
  0x32   : > { %p56_p3 = por %p55_p6, %p54_p2  ;;  %p1826_p7 = scmp.eq.s32.totalorder %s1611_s27, 1 }
  0x33   : > { %s42_s10 = ssub.s32 %s1528_s25, %s1843_s9  ;;  %s256_s14 = sand.u32 1, %s1520_s23  }
  0x34   : > { %1258 = dma.hbm_to_vmem [thread:$0]  (!%p1639_p11), %s1825_s4, 384, %s240_s12, [#allocation10], %s1538_s19, %s1538_s19, %s1539_s20  }
  0x35   : > { %p1671_p9 = por %p1826_p7, %p54_p2  ;;  %p45_p13 = scmp.eq.s32.totalorder %s42_s10, 0 }
  0x36   : > { %s1165_s12 = sshll.u32 %s256_s14, 2  ;;  %s1166_s15 = sshll.u32 %s1528_s25, 6 }
  0x37   : > { %s1680_s16 = scalar_select %p45_p13, %s1520_s23, %s47_s11  }
  0x38   : > { %s1828_s0 = sld [smem:[#allocation17_spill]]  ;;  %s260_s20 = scalar_lea.vmem [#allocation3], %s1165_s12 }
  0x39   : > { %s268_s28 = sshll.u32 %s260_s20, 4  ;;  %p1687_p11 = pnand %p1272_p12, %p56_p3  ;;  %s269_s28 = int_to_ptr.vmem [resolvable:$true] %s268_s28 }
  0x3a   : > { %s1830_s1 = sld [smem:[#allocation18_spill]]  ;;  %s257_s11 = scalar_lea.sflag [#allocation4], %s256_s14 }
  0x3b   : > { %p1386_p0 = pneg %p1687_p11  ;;  %s1397_s17 = scalar_lea.vmem %s269_s28, 64 }
  0x3c   : > { %p1398_p5 = scmp.ne.s32.totalorder %s269_s28, %s1397_s17  ;;  %s1540_s18 = smov [#allocation3]  }
  0x3d   : > { %s1402_s20 = sshll.u32 %s1540_s18, 4  ;;  %s1403_s20 = int_to_ptr.vmem [resolvable:$false] %s1402_s20 }
  0x3e   : > { %s266_s19 = scalar_lea.hbm %s1828_s0, %s1166_s15  ;;  %p1400_p10 = pnand %p1398_p5, %p1386_p0 }
  0x3f   : > { %s1404_s0 = scalar_lea.vmem %s1403_s20, 128  ;;  %p1405_p2 = scmp.lt.s32.totalorder %s269_s28, %s1403_s20 }
  0x40   : > { %s1694_s4 = scalar_lea.hbm %s1830_s1, %s1166_s15  ;;  %p1401_p1 = pneg %p1400_p10 }
  0x41   : > { %p1406_p6 = scmp.lt.s32.totalorder %s1404_s0, %s1397_s17 }
  0x43   : > { %p1407_p12 = por %p1406_p6, %p1405_p2 }
  0x45   : > { %p1408_p3 = pnand %p1407_p12, %p1401_p1 }
  0x47   : > { %1411 = shalt.err (!%p1408_p3)
}
  0x48   : > { %1262 = dma.hbm_to_vmem [thread:$0]  (!%p1687_p11), %s266_s19, 64, %s269_s28, %s257_s11  }
  0x49   : > { %s275_s2 = sand.u32 1, %s1532_s26   ;;  %s279_s14 = scalar_lea.vmem [#allocation6], %s1165_s12 }
  0x4a   : > { %s287_s15 = sshll.u32 %s279_s14, 4  ;;  %s276_s10 = scalar_lea.sflag [#allocation7], %s275_s2  ;;  %s288_s15 = int_to_ptr.vmem [resolvable:$true] %s287_s15 }
  0x4b   : > { %s1425_s1 = scalar_lea.vmem %s288_s15, 64  ;;  %s1541_s0 = smov [#allocation6]  }
  0x4c   : > { %p1426_p7 = scmp.ne.s32.totalorder %s288_s15, %s1425_s1  ;;  %s1430_s17 = sshll.u32 %s1541_s0, 4  ;;  %s1431_s17 = int_to_ptr.vmem [resolvable:$false] %s1430_s17 }
  0x4d   : > { %s1432_s18 = scalar_lea.vmem %s1431_s17, 128  ;;  %p1433_p10 = scmp.lt.s32.totalorder %s288_s15, %s1431_s17 }
  0x4e   : > { %p1428_p13 = pnand %p1426_p7, %p1386_p0  ;;  %p1434_p1 = scmp.lt.s32.totalorder %s1432_s18, %s1425_s1 }
  0x50   : > { %p1429_p5 = pneg %p1428_p13  ;;  %p1435_p2 = por %p1434_p1, %p1433_p10 }
  0x52   : > { %p1436_p6 = pnand %p1435_p2, %p1429_p5 }
  0x54   : > { %1439 = shalt.err (!%p1436_p6)
}
  0x55   : > { %1265 = dma.hbm_to_vmem [thread:$0]  (!%p1687_p11), %s1694_s4, 64, %s288_s15, %s276_s10  }
  0x56   : > { %296 = sbr.rel (%p1630_p8) target bundleno = 797 (0x31d), region = 44  ;;  %s1713_s12 = sand.u32 (!%p1630_p8), 1, %s1516_s22  }
  0x57   : > { %s1170_s19 = sshll.u32 (!%p1630_p8), %s1713_s12, 2  ;;  %s299_s28 = scalar_lea.sflag (!%p1630_p8), [#allocation4], %s1713_s12 }
  0x58   : > { %s302_s11 = scalar_lea.vmem (!%p1630_p8), [#allocation3], %s1170_s19 }
  0x5b   : > { %1491 = dma.done.wait (%p1620_p4), %s299_s28, 64  }
  0x5c   : > { %1493 = vsyncadd (%p1620_p4), %s299_s28, 4294967232  ;;  %s307_s1 = sand.u32 1, %s1611_s27   ;;  %s311_s7 = scalar_lea.vmem [#allocation6], %s1170_s19 }
  0x5d   : > { %s308_s4 = scalar_lea.sflag [#allocation7], %s307_s1 }
  0x5e   : > { %1495 = dma.done.wait (%p1620_p4), %s308_s4, 64  }
  0x5f   : > { %1497 = vsyncadd (%p1620_p4), %s308_s4, 4294967232  ;;  %p1831_p8 = scmp.eq.s32.totalorder %s1611_s27, 0 }
  0x61   : > { %1499 = dma.done.wait (%p1831_p8), [#allocation7], 192   ;;  %p1832_p11 = pmov %p1831_p8 }
  0x62   : > { %p1833_p0 = pmov %p1831_p8 }
  0x63   : > { %1501 = vsyncadd (%p1832_p11), [#allocation7], 4294967104 }
  0x64   : > { %1503 = dma.done.wait (%p1833_p0), [#allocation10], 384   ;;  %p1834_p12 = pmov %p1833_p0 }
  0x65   : > { %v388_v0 = vld [vmem:[%s302_s11] sm:$0xf]  ;;  %v353_v1 = vld [vmem:[%s311_s7] sm:$0xf]  ;;  %v447_v2 = vld [vmem:[#allocation8 + $0x4] sm:$0xf]  ;;  %v726_v29 = vlaneseq }
  0x66   : > { %1505 = vsyncadd (%p1834_p12), [#allocation10], 4294966912  ;;  %389 = vxpose.xlu0.b32.start.end [1/1] (short) (narrow) %v388_v0, 16  ;;  %vm454_vm0 = vcmask 1043456   ;;  %v435_v3 = vld [vmem:[#allocation8] sm:$0xf] }
  0x67   : > { %1208 = vmatprep.subr.msk.mxu0 %vm454_vm0, %v447_v2  ;;  %1213 = vmatprep.subr.msk.mxu1 %vm454_vm0, %v435_v3  ;;  %v628_v4 = vld [vmem:[#allocation8 + $0x8] sm:$0xf]  ;;  %vm421_vm1 = vcmask 31744   ;;  %vm386_vm2 = vcmask 27648   ;;  %vm424_vm3 = vcmask 31748   ;;  %v1542_v26 = vmov 0.0  }
  0x68   : > { %1209 = vmatpush3.msk.msra.mxu0 %vm454_vm0, %v447_v2  ;;  %1214 = vmatpush3.msk.msra.mxu1 %vm454_vm0, %v435_v3  ;;  %v748_v27 = vld [vmem:[#allocation9 + $0x8] sm:$0xff]  ;;  %v746_v28 = vld [vmem:[#allocation9] sm:$0xff]  ;;  %vm1543_vm4 = vmmov 0   ;;  %v727_v30 = vshrl.u32 %v726_v29, 7  ;;  %vm755_vm7 = vcmask 64512   ;;  %vm751_vm8 = vcmask 1046528  }
  0x69   : > { %1218 = vmatprep.subr.msk.mxu0 %vm454_vm0, %v628_v4  ;;  %1223 = vmatprep.subr.mxu1 %v1542_v26  ;;  %v1184_v38 = vld [vmem:[%s1811_s3] ss:$0 sm:$0xff]  ;;  %v901_v53 = vld [vmem:[#allocation9 + $0x10] sm:$0xff]  ;;  %vm902_vm9 = vcmask 1045504   ;;  %s1174_s2 = sshll.u32 %s1713_s12, 3  ;;  %s1190_s14 = sshll.u32 %s1524_s24, 7 }
  0x6a   : > { %v728_v33 = vadd.s32 8, %v727_v30  ;;  %v732_v43 = vadd.s32 4294967295, %v727_v30  ;;  %v1188_v0 = vld [vmem:[%s1813_s5] ss:$0 sm:$0xff]  ;;  %s352_s15 = scalar_lea.vmem [#allocation11], %s1174_s2  ;;  %s1765_s18 = scalar_lea.hbm %s1814_s6, %s1190_s14 }
  0x6b   : > { %354 = vxpose.xlu0.b32.start.end [1/1] (short) (narrow) %v353_v1, 8  ;;  %s1036_s10 = sshll.u32 %s352_s15, 4  ;;  %s1022_s19 = scalar_lea.sflag [#allocation5], %s1713_s12  ;;  %s1037_s10 = int_to_ptr.vmem [resolvable:$true] %s1036_s10 }
  0x6c   : > { %v733_v39 = vadd.s32 4294967295, %v728_v33  ;;  %vm734_vm6 = vcmp.ge.s32.totalorder %v732_v43, 0  ;;  %s1440_s28 = scalar_lea.vmem %s1037_s10, 128  ;;  %s1544_s11 = smov [#allocation11]  }
  0x6d   : > { %p1441_p4 = scmp.ne.s32.totalorder %s1037_s10, %s1440_s28  ;;  %s1444_s1 = sshll.u32 %s1544_s11, 4  ;;  %s1445_s1 = int_to_ptr.vmem [resolvable:$false] %s1444_s1 }
  0x6e   : > { %vm737_vm5 = vcmp.lt.s32.totalorder %v733_v39, 8  ;;  %s1446_s24 = scalar_lea.vmem %s1445_s1, 256  ;;  %p1447_p13 = scmp.lt.s32.totalorder %s1037_s10, %s1445_s1 }
  0x6f   : > { %p1442_p3 = pnand %p1441_p4, %p1671_p9  ;;  %p1448_p5 = scmp.lt.s32.totalorder %s1446_s24, %s1440_s28 }
  0x71   : > { %p1443_p7 = pneg %p1442_p3  ;;  %p1449_p10 = por %p1448_p5, %p1447_p13 }
  0x73   : > { %p1450_p1 = pnand %p1449_p10, %p1443_p7 }
  0xe2   : > { %v405_v5 = vpop.trf.xlu0 }
  0xe3   : > { %422 = vst.msk [vmem:[#allocation2 + $0x4] sm:$0xff] %vm421_vm1, %v405_v5 }
  0xe6   : > { %v406_v6 = vpop.trf.xlu0 }
  0xe7   : > { %423 = vst.msk [vmem:[#allocation2 + $0xc] sm:$0xff] %vm421_vm1, %v406_v6 }
  0xea   : > { %v370_v7 = vpop.trf.xlu0 }
  0xeb   : > { %387 = vst.msk [vmem:[#allocation2] sm:$0xf] %vm386_vm2, %v370_v7 }
  0xec   : > { %425 = vst.msk [vmem:[#allocation2 + $0x10] sm:$0xf0] %vm424_vm3, %v370_v7 }
  0xee   : > { %v428_v8 = vld [vmem:[#allocation2 + $0x10] ss:$2 sm:$0x3]  ;;  %v432_v9 = vld [vmem:[#allocation2 + $0x11] ss:$2 sm:$0x3] }
  0xef   : > { %v618_v10 = vld [vmem:[#allocation2 + $0x4] ss:$2 sm:$0xff]  ;;  %v622_v11 = vld [vmem:[#allocation2 + $0x5] ss:$2 sm:$0xff]  ;;  %v434_v21 = vmax.f32 %v428_v8, %v432_v9 }
  0xf0   : > { %v625_v22 = vmax.f32 %v618_v10, %v622_v11 }
  0xf2   : > { %v437_v12 = vld [vmem:[#allocation2 + $0x2] ss:$2 sm:$0xff]  ;;  %v441_v13 = vld [vmem:[#allocation2 + $0x3] ss:$2 sm:$0xff] }
  0xf3   : > { %v426_v14 = vld [vmem:[#allocation2] ss:$2 sm:$0xff]  ;;  %v444_v15 = vmax.f32 %v437_v12, %v441_v13  ;;  %v430_v16 = vld [vmem:[#allocation2 + $0x1] ss:$2 sm:$0xff] }
  0xf4   : > { %v439_v17 = vld [vmem:[#allocation2 + $0x12] ss:$2 sm:$0x3]  ;;  %v433_v18 = vmax.f32 %v426_v14, %v430_v16  ;;  %v443_v19 = vld [vmem:[#allocation2 + $0x13] ss:$2 sm:$0x3] }
  0xf5   : > { %1210 = vmatprep.mubr.msk.f32.mxu0 %vm421_vm1, %v444_v15  ;;  %v445_v20 = vmax.f32 %v439_v17, %v443_v19  ;;  %v620_v23 = vld [vmem:[#allocation2 + $0x14] ss:$2 sm:$0x3]  ;;  %v624_v24 = vld [vmem:[#allocation2 + $0x15] ss:$2 sm:$0x3] }
  0xf6   : > { %1215 = vmatprep.mubr.msk.f32.mxu1 %vm421_vm1, %v433_v18  ;;  %v626_v25 = vmax.f32 %v620_v23, %v624_v24 }
  0xf7   : > { %1211 = vmatmul.mubr.msk.f32.vlgmr.msra.gmra.mxu0 %vm421_vm1, %v445_v20  ;;  %1216 = vmatmul.mubr.msk.f32.vlgmr.msra.gmra.mxu1 %vm421_vm1, %v434_v21 }
  0xf8   : > { %1219 = vmatpush3.msk.msra.mxu0 %vm454_vm0, %v628_v4  ;;  %1220 = vmatprep.mubr.msk.f32.mxu0 %vm421_vm1, %v625_v22 }
  0xf9   : > { %1228 = vmatprep.subr.mxu0 %v1542_v26  ;;  %1224 = vmatpush3.msra.mxu1 %v748_v27 }
  0xfa   : > { %1225 = vmatprep.mubr.msk.f32.mxu1 %vm1543_vm4, %v1542_v26  ;;  %1233 = vmatprep.subr.mxu1 %v1542_v26 }
  0xfb   : > { %1221 = vmatmul.mubr.msk.f32.vlgmr.msra.gmra.mxu0 %vm421_vm1, %v626_v25 }
  0xfc   : > { %1229 = vmatpush3.msra.mxu0 %v746_v28  ;;  %1230 = vmatprep.mubr.msk.f32.mxu0 %vm1543_vm4, %v1542_v26 }
 0x1b7   : > { %v1212_v31 = vpop.f32.mrf.mxu0  ;;  %v1217_v32 = vpop.f32.mrf.mxu1 }
 0x1b8   : > { %v614_v36 = vadd.f32 %v1217_v32, %v1212_v31 }
 0x1b9   : > { %v524_v34 = vpop.f32.mrf.mxu0  ;;  %v608_v35 = vpop.f32.mrf.mxu1 }
 0x1ba   : > { %v609_v40 = vadd.f32 %v608_v35, %v524_v34 }
 0x1bb   : > { %v1222_v37 = vpop.f32.mrf.mxu0 }
 0x1bc   : > { %v714_v41 = vadd.f32 %v1222_v37, %v614_v36 }
 0x1bd   : > { %v704_v42 = vpop.f32.mrf.mxu0 }
 0x1be   : > { %v723_v44 = vadd.f32 %v1184_v38, %v714_v41  ;;  %v713_v45 = vadd.f32 %v704_v42, %v609_v40 }
 0x1c0   : > { %v725_v46 = vmax.f32 %v723_v44, 0.0  ;;  %v722_v47 = vadd.f32 %v1184_v38, %v713_v45 }
 0x1c2   : > { %v745_v48 = vsel %vm737_vm5, %v725_v46, 0.0  ;;  %v724_v49 = vmax.f32 %v722_v47, 0.0 }
 0x1c3   : > { %v753_v51 = vrot.slane %v745_v48, 1  ;;  %v904_v56 = vrot.slane %v745_v48, 2 }
 0x1c4   : > { %v744_v50 = vsel %vm734_vm6, %v724_v49, 0.0 }
 0x1c5   : > { %v752_v52 = vrot.slane %v744_v50, 1  ;;  %1231 = vmatmul.mubr.msk.f32.vlgmr.msra.gmra.mxu0 %vm755_vm7, %v744_v50  ;;  %v903_v54 = vrot.slane %v744_v50, 2 }
 0x1c7   : > { %v754_v55 = vsel %vm751_vm8, %v752_v52, %v753_v51  ;;  %v905_v57 = vsel %vm902_vm9, %v903_v54, %v904_v56 }
 0x1c8   : > { %1226 = vmatmul.mubr.msk.f32.vlgmr.msra.gmra.mxu1 %vm755_vm7, %v754_v55 }
 0x1c9   : > { %1234 = vmatpush3.msra.mxu1 %v901_v53  ;;  %1235 = vmatprep.mubr.msk.f32.mxu1 %vm1543_vm4, %v1542_v26 }
 0x1cc   : > { %1236 = vmatmul.mubr.msk.f32.vlgmr.msra.gmra.mxu1 %vm755_vm7, %v905_v57 }
 0x285   : > { %v896_v58 = vpop.f32.mrf.mxu0 }
 0x287   : > { %v1232_v59 = vpop.f32.mrf.mxu0 }
 0x288   : > { %v824_v60 = vpop.f32.mrf.mxu1 }
 0x289   : > { %v897_v62 = vadd.f32 %v896_v58, %v824_v60 }
 0x28a   : > { %v1227_v61 = vpop.f32.mrf.mxu1 }
 0x28c   : > { %v974_v63 = vpop.f32.mrf.mxu1 }
 0x28d   : > { %v978_v1 = vadd.f32 %v974_v63, %v897_v62 }
 0x28e   : > { %v1237_v2 = vpop.f32.mrf.mxu1 }
 0x28f   : > { %v986_v3 = vadd.f32 %v1188_v0, %v978_v1 }
 0x291   : > { %v987_v4 = vmax.f32 %v986_v3, 0.0 }
 0x293   : > { %988 = vxpose.xlu1.b32.start.end [1/1] (short) (narrow) %v987_v4, 8 }
 0x30f   : > { %v1004_v5 = vpop.trf.xlu1 }
 0x310   : > { %1020 = vst.msk [vmem:[%s352_s15] sm:$0xff] %vm755_vm7, %v1004_v5 }
 0x311   : > { %1453 = shalt.err (!%p1450_p1)
}
 0x312   : > { %s1454_s4 = scalar_lea.hbm %s1765_s18, 128  ;;  %s1458_s27 = scalar_lea.hbm %s1814_s6, 256 }
 0x313   : > { %p1455_p2 = scmp.ne.s32.totalorder %s1765_s18, %s1454_s4  ;;  %p1459_p11 = scmp.lt.s32.totalorder %s1765_s18, %s1814_s6 }
 0x314   : > { %p1460_p0 = scmp.lt.s32.totalorder %s1458_s27, %s1454_s4 }
 0x315   : > { %p1456_p6 = pnand %p1455_p2, %p1671_p9 }
 0x316   : > { %p1461_p12 = por %p1460_p0, %p1459_p11 }
 0x317   : > { %p1457_p8 = pneg %p1456_p6 }
 0x319   : > { %p1462_p4 = pnand %p1461_p12, %p1457_p8 }
 0x31b   : > { %1465 = shalt.err (!%p1462_p4)
}
 0x31c   : > { %1250 = dma.vmem_to_hbm [thread:$0]  (%p1671_p9), %s1037_s10, 128, %s1765_s18, %s1022_s19  }
 0x31d PF: > { %s1048_s20 = sand.u32 1, %s1512_s21   ;;  %p1835_p3 = scmp.ne.s32.totalorder %s1821_s30, 0 }
 0x31e   : > { %p1836_p7 = scmp.ge.s32.totalorder %s1532_s26, 2  ;;  %s1049_s2 = scalar_lea.sflag [#allocation5], %s1048_s20 }
 0x320   : > { %p1267_p13 = pnand %p1836_p7, %p1835_p3 }
 0x322   : > { %p1268_p5 = pneg %p1267_p13 }
 0x324   : > { %1507 = dma.done.wait (%p1268_p5), %s1049_s2, 128  }
 0x325   : > { %1509 = vsyncadd (%p1268_p5), %s1049_s2, 4294967168  ;;  %s26_s26 = sadd.s32 1, %s1532_s26   ;;  %s1837_s21 = smov %s1516_s22 }
 0x326   : > { %p23_p10 = scmp.ge.s32.totalorder %s26_s26, 4   ;;  %s1838_s22 = smov %s1520_s23 }
 0x327   : > { %s1839_s23 = smov %s1680_s16  ;;  %s1840_s24 = smov %s1528_s25 }
 0x328   : > { %s1841_s25 = smov %s1843_s9  ;;  %25 = sbr.rel (!%p23_p10) target bundleno = 14 (0xe), region = 125 }
 0x32d   :  { %1054 = vsyncpa [#allocation4], 1 }
 0x32e   :  { %1056 = vsyncpa [#allocation4 + $0x1], 1 }
 0x32f   :  { %1057 = vsyncpa [#allocation7], 1 }
 0x330   :  { %1059 = vsyncpa [#allocation7 + $0x1], 1 }
 0x331   :  { %1060 = vsyncpa [#allocation10], 1 }
 0x332   :  { %1061 = vsyncpa [#allocation5], 1 }
 0x333   :  { %1063 = vsyncpa [#allocation5 + $0x1], 1 }

</bundles_post_ra>
